<compile_context>
chip_gen: v6e
topology: v6e:2x2x1
jax: 0.10.0
libtpu: 0.0.40
codegen_flags: <defaults>
</compile_context>

<pallas_src>
import functools
import math

import jax
import jax.numpy as jnp
from jax.experimental import pallas as pl
from jax.experimental.pallas import tpu as pltpu

BN_EPS = 1e-5
_VMEM_LIMIT = 32 * 1024 * 1024


def _cparams():
    return pltpu.CompilerParams(dimension_semantics=("parallel",),
                                vmem_limit_bytes=_VMEM_LIMIT)


def _pick_tile(m, target):
    """Largest multiple-of-8 divisor of m that is <= target (falls back to m)."""
    t = min(target, m)
    t -= t % 8
    while t >= 8:
        if m % t == 0:
            return t
        t -= 8
    return m


# ----------------------------- kernels ------------------------------------------


def conv0_kernel(x_ref, w0_ref, z0_ref, st_ref):
    # 1x1 conv == matmul over channels; also emit this tile's BN partial sums.
    z = jnp.dot(x_ref[...], w0_ref[...], preferred_element_type=jnp.float32)
    z0_ref[...] = z
    s = jnp.sum(z, axis=0, keepdims=True)
    ss = jnp.sum(z * z, axis=0, keepdims=True)
    st_ref[...] = jnp.concatenate([s, ss], axis=0)[None]


def conv1_kernel(z0_ref, sc0_ref, sh0_ref, w1r_ref, z1_ref, st_ref, *, H, W):
    # bn0 (folded scale/shift) + ReLU, then the 3x3 conv (padding=1) as ONE K=9*Cm
    # matmul on an im2col slab built in VMEM. The halo is realized with zero rows
    # (covers the h-direction) plus masks for wrap-around across the W boundary,
    # so no padded copy of z0 ever round-trips through HBM.
    HW = H * W
    Cm = z0_ref.shape[-1]
    h0 = jnp.maximum(z0_ref[...].reshape(HW, Cm) * sc0_ref[...] + sh0_ref[...], 0.0)

    zrows = jnp.zeros((2 * W, Cm), jnp.float32)
    hpad = jnp.concatenate([zrows, h0, zrows], axis=0)          # (HW + 4W, Cm)
    wcol = jax.lax.broadcasted_iota(jnp.int32, (HW, 1), 0) % W  # w coordinate per row

    taps = []
    for dy in (-1, 0, 1):
        for dx in (-1, 0, 1):
            off = 2 * W + dy * W + dx
            t = hpad[off:off + HW, :]                 # row shift by dy*W + dx
            if dx == -1:
                t = jnp.where(wcol > 0, t, 0.0)       # no wrap across w == 0
            elif dx == 1:
                t = jnp.where(wcol < W - 1, t, 0.0)   # no wrap across w == W-1
            taps.append(t)
    col = jnp.concatenate(taps, axis=1)               # (HW, 9*Cm) im2col slab

    z1 = jnp.dot(col, w1r_ref[...], preferred_element_type=jnp.float32)
    z1_ref[...] = z1.reshape(1, HW, Cm)
    s = jnp.sum(z1, axis=0, keepdims=True)
    ss = jnp.sum(z1 * z1, axis=0, keepdims=True)
    st_ref[...] = jnp.concatenate([s, ss], axis=0)[None]


def conv2_stats_kernel(z1_ref, sc1_ref, sh1_ref, w2_ref, st_ref):
    # bn1 + ReLU + 1x1 conv; emit only the BN2 partial sums (z2 never written to HBM).
    h1 = jnp.maximum(z1_ref[...] * sc1_ref[...] + sh1_ref[...], 0.0)
    z2 = jnp.dot(h1, w2_ref[...], preferred_element_type=jnp.float32)
    s = jnp.sum(z2, axis=0, keepdims=True)
    ss = jnp.sum(z2 * z2, axis=0, keepdims=True)
    st_ref[...] = jnp.concatenate([s, ss], axis=0)[None]


def tail_kernel(z1_ref, x_ref, sc1_ref, sh1_ref, w2_ref, sc2_ref, sh2_ref, o_ref):
    # Recompute the cheap 1x1 matmul, apply bn2, residual add, final ReLU.
    h1 = jnp.maximum(z1_ref[...] * sc1_ref[...] + sh1_ref[...], 0.0)
    z2 = jnp.dot(h1, w2_ref[...], preferred_element_type=jnp.float32)
    o_ref[...] = jnp.maximum(z2 * sc2_ref[...] + sh2_ref[...] + x_ref[...], 0.0)


# ----------------------------- wrapper ------------------------------------------


def _finalize_bn(partials, count, gamma, beta):
    """Reduce per-tile (sum, sumsq) partials into folded per-channel scale / shift."""
    s = jnp.sum(partials, axis=0)                       # (2, Cf)
    mean = s[0] / count
    var = jnp.maximum(s[1] / count - mean * mean, 0.0)  # biased batch variance
    scale = gamma.reshape(1, -1) * jax.lax.rsqrt(var + BN_EPS)[None, :]
    shift = beta.reshape(1, -1) - mean[None, :] * scale
    return scale, shift


def bottleneck_forward(x_nchw, params, *, tile_m=512):
    (w0, cb0, g0, bt0, w1, cb1, g1, bt1, w2, cb2, g2, bt2) = params
    # Exact simplification: a per-channel conv bias added right before training-mode BN
    # cancels against the batch mean, so the biases are dropped from the kernel path.
    del cb0, cb1, cb2
    N, C, H, W = x_nchw.shape
    Cm = C // 4
    HW = H * W
    M = N * HW

    x2d = jnp.transpose(x_nchw, (0, 2, 3, 1)).reshape(M, C)   # NCHW -> (N*H*W, C)
    tm = _pick_tile(M, tile_m)
    nt = M // tm

    # ---- K1: conv0 (1x1) + BN0 partial sums, tiled over M rows ----
    z0, st0 = pl.pallas_call(
        conv0_kernel,
        out_shape=(jax.ShapeDtypeStruct((M, Cm), jnp.float32),
                   jax.ShapeDtypeStruct((nt, 2, Cm), jnp.float32)),
        grid=(nt,),
        in_specs=[pl.BlockSpec((tm, C), lambda i: (i, 0)),
                  pl.BlockSpec((C, Cm), lambda i: (0, 0))],
        out_specs=(pl.BlockSpec((tm, Cm), lambda i: (i, 0)),
                   pl.BlockSpec((1, 2, Cm), lambda i: (i, 0, 0))),
        compiler_params=_cparams(),
    )(x2d, w0)
    sc0, sh0 = _finalize_bn(st0, M, g0, bt0)

    # ---- K2: bn0+ReLU + 3x3 conv (single im2col matmul) + BN1 partials, per image ----
    w1r = w1.reshape(9 * Cm, Cm)
    z1im, st1 = pl.pallas_call(
        functools.partial(conv1_kernel, H=H, W=W),
        out_shape=(jax.ShapeDtypeStruct((N, HW, Cm), jnp.float32),
                   jax.ShapeDtypeStruct((N, 2, Cm), jnp.float32)),
        grid=(N,),
        in_specs=[pl.BlockSpec((1, HW, Cm), lambda n: (n, 0, 0)),
                  pl.BlockSpec((1, Cm), lambda n: (0, 0)),
                  pl.BlockSpec((1, Cm), lambda n: (0, 0)),
                  pl.BlockSpec((9 * Cm, Cm), lambda n: (0, 0))],
        out_specs=(pl.BlockSpec((1, HW, Cm), lambda n: (n, 0, 0)),
                   pl.BlockSpec((1, 2, Cm), lambda n: (n, 0, 0))),
        compiler_params=_cparams(),
    )(z0.reshape(N, HW, Cm), sc0, sh0, w1r)
    sc1, sh1 = _finalize_bn(st1, M, g1, bt1)
    z1 = z1im.reshape(M, Cm)

    # ---- K3: bn1+ReLU + conv2 (1x1) -> BN2 partials only (z2 stays in VMEM) ----
    st2 = pl.pallas_call(
        conv2_stats_kernel,
        out_shape=jax.ShapeDtypeStruct((nt, 2, C), jnp.float32),
        grid=(nt,),
        in_specs=[pl.BlockSpec((tm, Cm), lambda i: (i, 0)),
                  pl.BlockSpec((1, Cm), lambda i: (0, 0)),
                  pl.BlockSpec((1, Cm), lambda i: (0, 0)),
                  pl.BlockSpec((Cm, C), lambda i: (0, 0))],
        out_specs=pl.BlockSpec((1, 2, C), lambda i: (i, 0, 0)),
        compiler_params=_cparams(),
    )(z1, sc1, sh1, w2)
    sc2, sh2 = _finalize_bn(st2, M, g2, bt2)

    # ---- K4: recompute conv2, apply bn2, residual add, final ReLU ----
    out2d = pl.pallas_call(
        tail_kernel,
        out_shape=jax.ShapeDtypeStruct((M, C), jnp.float32),
        grid=(nt,),
        in_specs=[pl.BlockSpec((tm, Cm), lambda i: (i, 0)),
                  pl.BlockSpec((tm, C), lambda i: (i, 0)),
                  pl.BlockSpec((1, Cm), lambda i: (0, 0)),
                  pl.BlockSpec((1, Cm), lambda i: (0, 0)),
                  pl.BlockSpec((Cm, C), lambda i: (0, 0)),
                  pl.BlockSpec((1, C), lambda i: (0, 0)),
                  pl.BlockSpec((1, C), lambda i: (0, 0))],
        out_specs=pl.BlockSpec((tm, C), lambda i: (i, 0)),
        compiler_params=_cparams(),
    )(z1, x2d, sc1, sh1, w2, sc2, sh2)

    return jnp.transpose(out2d.reshape(N, H, W, C), (0, 3, 1, 2))   # back to NCHW


# ----------------------------- params & pure-JAX reference ------------------------


def init_params(key, c):
    """Deterministic synthetic parameters (shapes per Bottleneck.__init__).
    Conv weights stored in kernel-friendly layouts:
      conv0: torch (cm, c, 1, 1)  -> (c, cm)
      conv1: torch (cm, cm, 3, 3) -> (3, 3, cm_in, cm_out)
      conv2: torch (c, cm, 1, 1)  -> (cm, c)
    BN gamma/beta get a small perturbation around PyTorch's (1, 0) init."""
    cm = c // 4
    ks = jax.random.split(key, 12)

    def u(k, shape, bound):
        return jax.random.uniform(k, shape, jnp.float32, -bound, bound)

    w0 = u(ks[0], (c, cm), 1.0 / math.sqrt(c))
    cb0 = u(ks[1], (1, cm), 1.0 / math.sqrt(c))
    w1 = u(ks[2], (3, 3, cm, cm), 1.0 / math.sqrt(cm * 9))
    cb1 = u(ks[3], (1, cm), 1.0 / math.sqrt(cm * 9))
    w2 = u(ks[4], (cm, c), 1.0 / math.sqrt(cm))
    cb2 = u(ks[5], (1, c), 1.0 / math.sqrt(cm))
    g0 = 1.0 + 0.1 * u(ks[6], (1, cm), 1.0)
    bt0 = 0.1 * u(ks[7], (1, cm), 1.0)
    g1 = 1.0 + 0.1 * u(ks[8], (1, cm), 1.0)
    bt1 = 0.1 * u(ks[9], (1, cm), 1.0)
    g2 = 1.0 + 0.1 * u(ks[10], (1, c), 1.0)
    bt2 = 0.1 * u(ks[11], (1, c), 1.0)
    return (w0, cb0, g0, bt0, w1, cb1, g1, bt1, w2, cb2, g2, bt2)


def reference_forward(x_nchw, params):
    """Pure-JAX reference mirroring the PyTorch forward (training-mode BN, with biases)."""
    (w0, cb0, g0, bt0, w1, cb1, g1, bt1, w2, cb2, g2, bt2) = params
    x = jnp.transpose(x_nchw, (0, 2, 3, 1))

    def conv(h, w_hwio, pad):
        return jax.lax.conv_general_dilated(
            h, w_hwio, (1, 1), pad, dimension_numbers=('NHWC', 'HWIO', 'NHWC'))

    def bn(z, g, bt):
        m = jnp.mean(z, axis=(0, 1, 2), keepdims=True)
        v = jnp.mean(jnp.square(z - m), axis=(0, 1, 2), keepdims=True)
        return (z - m) * jax.lax.rsqrt(v + BN_EPS) * g.reshape(1, 1, 1, -1) + bt.reshape(1, 1, 1, -1)

    h = conv(x, w0[None, None], 'VALID') + cb0.reshape(1, 1, 1, -1)
    h = jnp.maximum(bn(h, g0, bt0), 0.0)
    h = conv(h, w1, ((1, 1), (1, 1))) + cb1.reshape(1, 1, 1, -1)
    h = jnp.maximum(bn(h, g1, bt1), 0.0)
    h = conv(h, w2[None, None], 'VALID') + cb2.reshape(1, 1, 1, -1)
    h = bn(h, g2, bt2)
    h = jnp.maximum(h + x, 0.0)
    return jnp.transpose(h, (0, 3, 1, 2))


if __name__ == "__main__":
    key = jax.random.PRNGKey(0)
    kx, kp = jax.random.split(key)
    C = 32                                                     # -> bottleneck channels Cm = 8
    x = jax.random.normal(kx, (2, C, 16, 16), jnp.float32)     # NCHW, like the PyTorch module
    params = init_params(kp, C)

    # tile_m=128 -> a 4-tile grid at this small size, exercising the cross-tile BN path.
    out = jax.block_until_ready(bottleneck_forward(x, params, tile_m=128))
    ref = jax.block_until_ready(reference_forward(x, params))

    assert out.shape == x.shape, (out.shape, x.shape)
    max_err = float(jnp.max(jnp.abs(out - ref)))
    if not jnp.allclose(out, ref, atol=5e-4, rtol=5e-4):
        raise AssertionError(f"Pallas result mismatch vs JAX reference, max abs err = {max_err}")
    print("KERNEL_OK")
</pallas_src>

<mosaic_0001>
module attributes {stable_mosaic.version = 11 : i64} {
  func.func @conv0_kernel(%arg0: i32, %arg1: memref<128x32xf32, #tpu.memory_space<vmem>>, %arg2: memref<32x8xf32, #tpu.memory_space<vmem>>, %arg3: memref<128x8xf32, #tpu.memory_space<vmem>>, %arg4: memref<1x2x8xf32, #tpu.memory_space<vmem>>) attributes {dimension_semantics = [#tpu.dimension_semantics<parallel>], iteration_bounds = array<i64: 4>, scalar_prefetch = 0 : i64, scratch_operands = 0 : i64, tpu.core_type = #tpu.core_type<tc>, window_params = [{transform_indices = @transform_0, window_bounds = array<i64: 128, 32>}, {pipeline_mode = #tpu.pipeline_mode<synchronous>, transform_indices = @transform_1, window_bounds = array<i64: 32, 8>}, {transform_indices = @transform_2, window_bounds = array<i64: 128, 8>}, {transform_indices = @transform_3, window_bounds = array<i64: 1, 2, 8>}]} {
    %c0 = arith.constant 0 : index
    %c0_0 = arith.constant 0 : index
    %0 = vector.load %arg1[%c0, %c0_0] : memref<128x32xf32, #tpu.memory_space<vmem>>, vector<128x32xf32>
    %c0_1 = arith.constant 0 : index
    %c0_2 = arith.constant 0 : index
    %1 = vector.load %arg2[%c0_1, %c0_2] : memref<32x8xf32, #tpu.memory_space<vmem>>, vector<32x8xf32>
    %cst = arith.constant dense<0.000000e+00> : vector<128x8xf32>
    %2 = tpu.matmul %0, %1, %cst {dimension_numbers = #tpu.dot_dimension_numbers<[1], [0], [0], [1], [0, 0, 1, 1], [], []>} : vector<128x32xf32>, vector<32x8xf32>, vector<128x8xf32> -> vector<128x8xf32>
    %c0_3 = arith.constant 0 : index
    %c0_4 = arith.constant 0 : index
    %3 = vector.load %arg3[%c0_3, %c0_4] : memref<128x8xf32, #tpu.memory_space<vmem>>, vector<128x8xf32>
    tpu.vector_store %arg3[%c0_3, %c0_4], %2 {strides = array<i32>} : memref<128x8xf32, #tpu.memory_space<vmem>>, vector<128x8xf32>,
    %cst_5 = arith.constant dense<0.000000e+00> : vector<8xf32>
    %4 = vector.multi_reduction <add>, %2, %cst_5 [0] : vector<128x8xf32> to vector<8xf32>
    %5 = vector.shape_cast %4 : vector<8xf32> to vector<1x8xf32>
    %6 = arith.mulf %2, %2 : vector<128x8xf32>
    %cst_6 = arith.constant dense<0.000000e+00> : vector<8xf32>
    %7 = vector.multi_reduction <add>, %6, %cst_6 [0] : vector<128x8xf32> to vector<8xf32>
    %8 = vector.shape_cast %7 : vector<8xf32> to vector<1x8xf32>
    %9 = tpu.concatenate %5, %8 in 0 : vector<1x8xf32>, vector<1x8xf32> -> vector<2x8xf32>
    %10 = vector.shape_cast %9 : vector<2x8xf32> to vector<1x2x8xf32>
    %c0_7 = arith.constant 0 : index
    %c0_8 = arith.constant 0 : index
    %c0_9 = arith.constant 0 : index
    %11 = vector.load %arg4[%c0_7, %c0_8, %c0_9] : memref<1x2x8xf32, #tpu.memory_space<vmem>>, vector<1x2x8xf32>
    tpu.vector_store %arg4[%c0_7, %c0_8, %c0_9], %10 {strides = array<i32>} : memref<1x2x8xf32, #tpu.memory_space<vmem>>, vector<1x2x8xf32>,
    return
  }
  func.func @transform_0(%arg0: i32) -> (i32, i32) {
    %c0_i32 = arith.constant 0 : i32
    %c0_i32_0 = arith.constant 0 : i32
    return %arg0, %c0_i32 : i32, i32
  }
  func.func @transform_1(%arg0: i32) -> (i32, i32) {
    %c0_i32 = arith.constant 0 : i32
    %c0_i32_0 = arith.constant 0 : i32
    %c0_i32_1 = arith.constant 0 : i32
    return %c0_i32, %c0_i32_0 : i32, i32
  }
  func.func @transform_2(%arg0: i32) -> (i32, i32) {
    %c0_i32 = arith.constant 0 : i32
    %c0_i32_0 = arith.constant 0 : i32
    return %arg0, %c0_i32 : i32, i32
  }
  func.func @transform_3(%arg0: i32) -> (i32, i32, i32) {
    %c0_i32 = arith.constant 0 : i32
    %c0_i32_0 = arith.constant 0 : i32
    %c0_i32_1 = arith.constant 0 : i32
    return %arg0, %c0_i32, %c0_i32_0 : i32, i32, i32
  }
}

</mosaic_0001>

<bundles_post_ra>
// kernel: tpu_custom_call.1
= control target key start
LH: loop header
LB: loop body
LE: loop exit
PB: predicated region body
PF: predicated region fallthrough
CT: control target
= control target key end

     0   :  { %9 = vsyncpa [#allocation3], 0  ;;  %s1054_s0 = inlined_call_operand.vmem [shape: f32[512,32], index: 0, kind: input, shape index: {}]   ;;  %s1055_s1 = inlined_call_operand.vmem [shape: f32[32,8], index: 1, kind: input, shape index: {}]   ;;  %s1056_s2 = inlined_call_operand.vmem [shape: f32[512,8], index: 2, kind: output, shape index: {0}]   ;;  %s1057_s3 = inlined_call_operand.hbm [shape: f32[4,2,8], index: 3, kind: output, shape index: {1}]  }
   0x1   :  { %11 = vsyncpa [#allocation3 + $0x1], 0  ;;  %s828_s12 = smov 0   ;;  %s830_s13 = smov 0  }
   0x2   :  { %s832_s14 = smov 0   ;;  %s834_s15 = smov 0  }
   0x3 LB: > { %s849_s16 = sadd.s32 4294967295, %s805_s15   ;;  %s617_s17 = sadd.s32 4294967294, %s805_s15   ;;  %s805_s15 = sphi %s834_s15, %s1063_s15   ;;  %s801_s14 = sphi %s832_s14, %s1062_s14   ;;  %s797_s13 = sphi %s830_s13, %s1061_s13   ;;  %s793_s12 = sphi %s828_s12, %s1060_s12  }
   0x4   : > { %s853_s18 = sadd.s32 1, %s805_s15   ;;  %s97_s19 = sadd.s32 1, %s801_s14 }
   0x5   : > { %s94_s20 = ssub.s32 %s805_s15, %s853_s18  ;;  %p107_p0 = scmp.ne.s32.totalorder %s801_s14, %s797_s13 }
   0x6   : > { %p95_p1 = scmp.eq.s32.totalorder %s94_s20, 0  ;;  %p108_p2 = scmp.eq.s32.totalorder %s849_s16, 3 }
   0x7   : > { %p113_p3 = scmp.ne.s32.totalorder %s797_s13, %s793_s12  ;;  %p114_p4 = scmp.eq.s32.totalorder %s617_s17, 3 }
   0x8   : > { %s864_s21 = scalar_select %p95_p1, %s801_s14, %s97_s19  }
   0x9   : > { %p866_p5 = por %p108_p2, %p107_p0  ;;  %p870_p6 = por %p114_p4, %p113_p3 }
   0xa   : > { %p620_p7 = scmp.ge.s32.totalorder %s805_s15, 1  ;;  %p144_p8 = scmp.lt.s32.totalorder %s805_s15, 5 }
   0xc   : > { %p145_p9 = pnand %p620_p7, %p144_p8 }
   0xd   : > { %s622_s28 = sshll.u32 (!%p145_p9), %s849_s16, 4  ;;  %s170_s19 = sand.u32 (!%p145_p9), 1, %s797_s13  }
   0xe   : > { %148 = sbr.rel (%p145_p9) target bundleno = 284 (0x11c), region = 28  ;;  %p174_p10 = scmp.lt.s32.totalorder (!%p145_p9), %s622_s28, 63 }
   0xf   : > { %s621_s20 = sshll.u32 (!%p145_p9), %s170_s19, 1  ;;  %s643_s24 = sshll.u32 (!%p145_p9), %s849_s16, 5 }
  0x10   : > { %s172_s25 = scalar_lea.vmem (!%p145_p9), [#allocation2], %s621_s20  ;;  %s1019_s29 = scalar_lea.hbm (!%p145_p9), %s1057_s3, %s643_s24 }
  0x11   : > { %s533_s26 = sshll.u32 (!%p145_p9), %s172_s25, 4  ;;  %s516_s30 = scalar_lea.sflag (!%p145_p9), [#allocation3], %s170_s19  ;;  %s534_s26 = int_to_ptr.vmem [resolvable:$true] %s533_s26 }
  0x12   : > { %s745_s4 = scalar_lea.vmem (!%p145_p9), %s534_s26, 32  ;;  %s807_s16 = smov (!%p145_p9), [#allocation2]  }
  0x13   : > { %v204_v0 = vld [vmem:[%s1055_s1 + $0x18] sm:$0xff]  ;;  %v203_v1 = vld [vmem:[%s1055_s1 + $0x10] sm:$0xff]  ;;  %v202_v2 = vld [vmem:[%s1055_s1 + $0x8] sm:$0xff]  ;;  %s1065_s28 = smov (!%p174_p10, %s622_s28), 63  ;;  %vm205_vm0 = vcmask 261120   ;;  %vm399_vm1 = vcmask 64512   ;;  %p746_p11 = scmp.ne.s32.totalorder %s534_s26, %s745_s4 }
  0x14   : > { %666 = vmatprep.subr.mxu0 %v204_v0  ;;  %698 = vmatprep.subr.mxu1 %v204_v0  ;;  %v201_v3 = vld [vmem:[%s1055_s1] sm:$0xff]  ;;  %s623_s6 = sshll.u32 %s1065_s28, 3  ;;  %vm506_vm2 = vcmask 1040384   ;;  %vm508_vm3 = vcmask 58368   ;;  %s749_s5 = sshll.u32 %s807_s16, 4  ;;  %s750_s5 = int_to_ptr.vmem [resolvable:$false] %s749_s5 }
  0x15   : > { %667 = vmatpush3.msra.mxu0 %v204_v0  ;;  %702 = vmatpush3.msra.mxu1 %v204_v0  ;;  %s897_s9 = scalar_lea.vmem %s1054_s0, %s623_s6  ;;  %s936_s17 = scalar_lea.vmem %s1056_s2, %s623_s6 }
  0x16   : > { %668 = vmatprep.subr.mxu0 %v203_v1  ;;  %699 = vmatprep.subr.mxu1 %v203_v1  ;;  %v185_v4 = vld [vmem:[%s897_s9] sm:$0xff]  ;;  %v186_v5 = vld [vmem:[%s897_s9 + $0x8] sm:$0xff]  ;;  %v187_v6 = vld [vmem:[%s897_s9 + $0x10] sm:$0xff]  ;;  %p747_p12 = pnand %p746_p11, %p866_p5  ;;  %s751_s6 = scalar_lea.vmem %s750_s5, 64 }
  0x17   : > { %669 = vmatpush3.msra.mxu0 %v203_v1  ;;  %703 = vmatpush3.msra.mxu1 %v203_v1  ;;  %v193_v7 = vld [vmem:[%s897_s9 + $0x40] sm:$0xff]  ;;  %v188_v8 = vld [vmem:[%s897_s9 + $0x18] sm:$0xff]  ;;  %v194_v9 = vld [vmem:[%s897_s9 + $0x48] sm:$0xff]  ;;  %p752_p0 = scmp.lt.s32.totalorder %s534_s26, %s750_s5  ;;  %p753_p1 = scmp.lt.s32.totalorder %s751_s6, %s745_s4 }
  0x18   : > { %670 = vmatprep.subr.mxu0 %v202_v2  ;;  %700 = vmatprep.subr.mxu1 %v202_v2  ;;  %v195_v10 = vld [vmem:[%s897_s9 + $0x50] sm:$0xff]  ;;  %v189_v11 = vld [vmem:[%s897_s9 + $0x20] sm:$0xff]  ;;  %v196_v12 = vld [vmem:[%s897_s9 + $0x58] sm:$0xff]  ;;  %p748_p13 = pneg %p747_p12 }
  0x19   : > { %671 = vmatpush3.msra.mxu0 %v202_v2  ;;  %704 = vmatpush3.msra.mxu1 %v202_v2  ;;  %v197_v13 = vld [vmem:[%s897_s9 + $0x60] sm:$0xff]  ;;  %v190_v14 = vld [vmem:[%s897_s9 + $0x28] sm:$0xff]  ;;  %v191_v15 = vld [vmem:[%s897_s9 + $0x30] sm:$0xff]  ;;  %p754_p2 = por %p753_p1, %p752_p0 }
  0x1a   : > { %672 = vmatprep.subr.mxu0 %v201_v3  ;;  %701 = vmatprep.subr.mxu1 %v201_v3  ;;  %v198_v16 = vld [vmem:[%s897_s9 + $0x68] sm:$0xff]  ;;  %v199_v17 = vld [vmem:[%s897_s9 + $0x70] sm:$0xff]  ;;  %v192_v18 = vld [vmem:[%s897_s9 + $0x38] sm:$0xff] }
  0x1b   : > { %673 = vmatpush3.msra.mxu0 %v201_v3  ;;  %674 = vmatprep.mubr.msk.f32.mxu0 %vm205_vm0, %v185_v4  ;;  %v200_v19 = vld [vmem:[%s897_s9 + $0x78] sm:$0xff]  ;;  %p755_p3 = pnand %p754_p2, %p748_p13 }
  0x1c   : > { %675 = vmatmul.mubr.msk.f32.vlgmr.msra.gmra.mxu0 %vm205_vm0, %v186_v5  ;;  %705 = vmatpush3.msra.mxu1 %v201_v3 }
  0x1d   : > { %677 = vmatprep.mubr.msk.f32.mxu0 %vm205_vm0, %v187_v6  ;;  %686 = vmatprep.mubr.msk.f32.mxu1 %vm205_vm0, %v193_v7 }
  0x1e   : > { %687 = vmatmul.mubr.msk.f32.vlgmr.msra.gmra.mxu1 %vm205_vm0, %v194_v9 }
  0x1f   : > { %689 = vmatprep.mubr.msk.f32.mxu1 %vm205_vm0, %v195_v10 }
  0x20   : > { %678 = vmatmul.mubr.msk.f32.gmra.mxu0 %vm205_vm0, %v188_v8 }
  0x21   : > { %680 = vmatprep.mubr.msk.f32.mxu0 %vm205_vm0, %v189_v11 }
  0x22   : > { %690 = vmatmul.mubr.msk.f32.gmra.mxu1 %vm205_vm0, %v196_v12 }
  0x23   : > { %692 = vmatprep.mubr.msk.f32.mxu1 %vm205_vm0, %v197_v13 }
  0x24   : > { %681 = vmatmul.mubr.msk.f32.gmra.mxu0 %vm205_vm0, %v190_v14 }
  0x25   : > { %683 = vmatprep.mubr.msk.f32.mxu0 %vm205_vm0, %v191_v15 }
  0x26   : > { %693 = vmatmul.mubr.msk.f32.gmra.mxu1 %vm205_vm0, %v198_v16 }
  0x27   : > { %695 = vmatprep.mubr.msk.f32.mxu1 %vm205_vm0, %v199_v17 }
  0x28   : > { %684 = vmatmul.mubr.msk.f32.gmra.mxu0 %vm205_vm0, %v192_v18 }
  0x2a   : > { %696 = vmatmul.mubr.msk.f32.gmra.mxu1 %vm205_vm0, %v200_v19 }
  0xdc   : > { %v676_v20 = vpop.f32.mrf.mxu0 }
  0xdd   : > { %401 = vst.msk [vmem:[%s936_s17 + $0x8] sm:$0xff] %vm399_vm1, %v676_v20  ;;  %v454_v23 = vmul.f32 %v676_v20, %v676_v20  ;;  %v417_v28 = vsel %vm399_vm1, %v676_v20, 0.0 }
  0xde   : > { %v320_v21 = vpop.f32.mrf.mxu0  ;;  %v940_v22 = vpop.f32.mrf.mxu1 }
  0xdf   : > { %400 = vst.msk [vmem:[%s936_s17] sm:$0xff] %vm399_vm1, %v320_v21  ;;  %v416_v24 = vsel %vm399_vm1, %v320_v21, 0.0  ;;  %v453_v25 = vmul.f32 %v320_v21, %v320_v21  ;;  %409 = vst.msk [vmem:[%s936_s17 + $0x48] sm:$0xff] %vm399_vm1, %v940_v22  ;;  %v470_v33 = vsel %vm399_vm1, %v454_v23, 0.0  ;;  %v462_v10 = vmul.f32 %v940_v22, %v940_v22 }
  0xe0   : > { %v679_v26 = vpop.f32.mrf.mxu0  ;;  %v360_v27 = vpop.f32.mrf.mxu1  ;;  %v418_v30 = vadd.f32 %v417_v28, %v416_v24  ;;  %v433_v14 = vsel %vm399_vm1, %v940_v22, 0.0 }
  0xe1   : > { %v469_v29 = vsel %vm399_vm1, %v453_v25, 0.0  ;;  %403 = vst.msk [vmem:[%s936_s17 + $0x18] sm:$0xff] %vm399_vm1, %v679_v26  ;;  %408 = vst.msk [vmem:[%s936_s17 + $0x40] sm:$0xff] %vm399_vm1, %v360_v27  ;;  %v456_v34 = vmul.f32 %v679_v26, %v679_v26  ;;  %v421_v41 = vsel %vm399_vm1, %v679_v26, 0.0  ;;  %v461_v6 = vmul.f32 %v360_v27, %v360_v27 }
  0xe2   : > { %v330_v31 = vpop.f32.mrf.mxu0  ;;  %v954_v32 = vpop.f32.mrf.mxu1  ;;  %v471_v37 = vadd.f32 %v470_v33, %v469_v29  ;;  %v431_v11 = vsel %vm399_vm1, %v360_v27, 0.0  ;;  %v486_v19 = vsel %vm399_vm1, %v462_v10, 0.0 }
  0xe3   : > { %402 = vst.msk [vmem:[%s936_s17 + $0x10] sm:$0xff] %vm399_vm1, %v330_v31  ;;  %v419_v35 = vsel %vm399_vm1, %v330_v31, 0.0  ;;  %v455_v36 = vmul.f32 %v330_v31, %v330_v31  ;;  %411 = vst.msk [vmem:[%s936_s17 + $0x58] sm:$0xff] %vm399_vm1, %v954_v32  ;;  %v474_v47 = vsel %vm399_vm1, %v456_v34, 0.0  ;;  %v484_v15 = vsel %vm399_vm1, %v461_v6, 0.0 }
  0xe4   : > { %v420_v38 = vadd.f32 %v419_v35, %v418_v30  ;;  %v682_v39 = vpop.f32.mrf.mxu0  ;;  %v370_v40 = vpop.f32.mrf.mxu1  ;;  %v464_v20 = vmul.f32 %v954_v32, %v954_v32  ;;  %v437_v25 = vsel %vm399_vm1, %v954_v32, 0.0 }
  0xe5   : > { %v472_v42 = vsel %vm399_vm1, %v455_v36, 0.0  ;;  %405 = vst.msk [vmem:[%s936_s17 + $0x28] sm:$0xff] %vm399_vm1, %v682_v39  ;;  %410 = vst.msk [vmem:[%s936_s17 + $0x50] sm:$0xff] %vm399_vm1, %v370_v40  ;;  %v458_v48 = vmul.f32 %v682_v39, %v682_v39  ;;  %v425_v55 = vsel %vm399_vm1, %v682_v39, 0.0  ;;  %v463_v16 = vmul.f32 %v370_v40, %v370_v40 }
  0xe6   : > { %v473_v43 = vadd.f32 %v472_v42, %v471_v37  ;;  %v340_v44 = vpop.f32.mrf.mxu0  ;;  %v422_v45 = vadd.f32 %v421_v41, %v420_v38  ;;  %v694_v46 = vpop.f32.mrf.mxu1  ;;  %v435_v21 = vsel %vm399_vm1, %v370_v40, 0.0  ;;  %v490_v29 = vsel %vm399_vm1, %v464_v20, 0.0 }
  0xe7   : > { %404 = vst.msk [vmem:[%s936_s17 + $0x20] sm:$0xff] %vm399_vm1, %v340_v44  ;;  %v423_v49 = vsel %vm399_vm1, %v340_v44, 0.0  ;;  %v457_v50 = vmul.f32 %v340_v44, %v340_v44  ;;  %413 = vst.msk [vmem:[%s936_s17 + $0x68] sm:$0xff] %vm399_vm1, %v694_v46  ;;  %v478_v61 = vsel %vm399_vm1, %v458_v48, 0.0  ;;  %v488_v26 = vsel %vm399_vm1, %v463_v16, 0.0 }
  0xe8   : > { %v424_v51 = vadd.f32 %v423_v49, %v422_v45  ;;  %v475_v52 = vadd.f32 %v474_v47, %v473_v43  ;;  %v685_v53 = vpop.f32.mrf.mxu0  ;;  %v380_v54 = vpop.f32.mrf.mxu1  ;;  %v466_v30 = vmul.f32 %v694_v46, %v694_v46  ;;  %v441_v35 = vsel %vm399_vm1, %v694_v46, 0.0 }
  0xe9   : > { %v476_v56 = vsel %vm399_vm1, %v457_v50, 0.0  ;;  %407 = vst.msk [vmem:[%s936_s17 + $0x38] sm:$0xff] %vm399_vm1, %v685_v53  ;;  %412 = vst.msk [vmem:[%s936_s17 + $0x60] sm:$0xff] %vm399_vm1, %v380_v54  ;;  %v460_v62 = vmul.f32 %v685_v53, %v685_v53  ;;  %v429_v4 = vsel %vm399_vm1, %v685_v53, 0.0  ;;  %v465_v22 = vmul.f32 %v380_v54, %v380_v54 }
  0xea   : > { %v477_v57 = vadd.f32 %v476_v56, %v475_v52  ;;  %v350_v58 = vpop.f32.mrf.mxu0  ;;  %v426_v59 = vadd.f32 %v425_v55, %v424_v51  ;;  %v697_v60 = vpop.f32.mrf.mxu1  ;;  %v439_v31 = vsel %vm399_vm1, %v380_v54, 0.0  ;;  %v494_v39 = vsel %vm399_vm1, %v466_v30, 0.0 }
  0xeb   : > { %406 = vst.msk [vmem:[%s936_s17 + $0x30] sm:$0xff] %vm399_vm1, %v350_v58  ;;  %v427_v63 = vsel %vm399_vm1, %v350_v58, 0.0  ;;  %v459_v0 = vmul.f32 %v350_v58, %v350_v58  ;;  %415 = vst.msk [vmem:[%s936_s17 + $0x78] sm:$0xff] %vm399_vm1, %v697_v60  ;;  %v482_v9 = vsel %vm399_vm1, %v460_v62, 0.0  ;;  %v492_v36 = vsel %vm399_vm1, %v465_v22, 0.0 }
  0xec   : > { %v428_v1 = vadd.f32 %v427_v63, %v426_v59  ;;  %v479_v2 = vadd.f32 %v478_v61, %v477_v57  ;;  %v390_v3 = vpop.f32.mrf.mxu1  ;;  %v468_v40 = vmul.f32 %v697_v60, %v697_v60  ;;  %v445_v44 = vsel %vm399_vm1, %v697_v60, 0.0 }
  0xed   : > { %v480_v5 = vsel %vm399_vm1, %v459_v0, 0.0  ;;  %414 = vst.msk [vmem:[%s936_s17 + $0x70] sm:$0xff] %vm399_vm1, %v390_v3  ;;  %v467_v37 = vmul.f32 %v390_v3, %v390_v3  ;;  %v443_v41 = vsel %vm399_vm1, %v390_v3, 0.0 }
  0xee   : > { %v430_v7 = vadd.f32 %v429_v4, %v428_v1  ;;  %v481_v8 = vadd.f32 %v480_v5, %v479_v2  ;;  %v498_v48 = vsel %vm399_vm1, %v468_v40, 0.0 }
  0xef   : > { %v496_v45 = vsel %vm399_vm1, %v467_v37, 0.0 }
  0xf0   : > { %v483_v12 = vadd.f32 %v482_v9, %v481_v8  ;;  %v432_v13 = vadd.f32 %v431_v11, %v430_v7 }
  0xf2   : > { %v485_v17 = vadd.f32 %v484_v15, %v483_v12  ;;  %v434_v18 = vadd.f32 %v433_v14, %v432_v13 }
  0xf4   : > { %v436_v23 = vadd.f32 %v435_v21, %v434_v18  ;;  %v487_v24 = vadd.f32 %v486_v19, %v485_v17 }
  0xf6   : > { %v489_v27 = vadd.f32 %v488_v26, %v487_v24  ;;  %v438_v28 = vadd.f32 %v437_v25, %v436_v23 }
  0xf8   : > { %v440_v33 = vadd.f32 %v439_v31, %v438_v28  ;;  %v491_v34 = vadd.f32 %v490_v29, %v489_v27 }
  0xfa   : > { %v493_v38 = vadd.f32 %v492_v36, %v491_v34  ;;  %v442_v32 = vadd.f32 %v441_v35, %v440_v33 }
  0xfc   : > { %v444_v42 = vadd.f32 %v443_v41, %v442_v32  ;;  %v495_v43 = vadd.f32 %v494_v39, %v493_v38 }
  0xfe   : > { %v446_v47 = vadd.f32 %v445_v44, %v444_v42  ;;  %v497_v46 = vadd.f32 %v496_v45, %v495_v43 }
 0x100   : > { %v447_v49 = vrot.slane %v446_v47, 4  ;;  %v499_v50 = vadd.f32 %v498_v48, %v497_v46 }
 0x102   : > { %v448_v51 = vadd.f32 %v447_v49, %v446_v47  ;;  %v500_v52 = vrot.slane %v499_v50, 4 }
 0x104   : > { %v449_v53 = vrot.slane %v448_v51, 2  ;;  %v501_v54 = vadd.f32 %v500_v52, %v499_v50 }
 0x106   : > { %v450_v55 = vadd.f32 %v449_v53, %v448_v51  ;;  %v502_v56 = vrot.slane %v501_v54, 2 }
 0x108   : > { %v451_v57 = vrot.slane %v450_v55, 1  ;;  %v503_v58 = vadd.f32 %v502_v56, %v501_v54 }
 0x10a   : > { %v504_v59 = vrot.slane %v503_v58, 1  ;;  %v452_v60 = vadd.f32 %v451_v57, %v450_v55 }
 0x10c   : > { %v505_v61 = vadd.f32 %v504_v59, %v503_v58 }
 0x10e   : > { %v507_v62 = vsel %vm506_vm2, %v452_v60, %v505_v61 }
 0x10f   : > { %509 = vst.msk [vmem:[%s172_s25] sm:$0x3] %vm508_vm3, %v507_v62 }
 0x110   : > { %758 = shalt.err (!%p755_p3)
}
 0x111   : > { %s759_s7 = scalar_lea.hbm %s1019_s29, 32  ;;  %s763_s10 = scalar_lea.hbm %s1057_s3, 128 }
 0x112   : > { %p760_p4 = scmp.ne.s32.totalorder %s1019_s29, %s759_s7  ;;  %p764_p9 = scmp.lt.s32.totalorder %s1019_s29, %s1057_s3 }
 0x113   : > { %p765_p10 = scmp.lt.s32.totalorder %s763_s10, %s759_s7 }
 0x114   : > { %p761_p7 = pnand %p760_p4, %p866_p5 }
 0x115   : > { %p766_p11 = por %p765_p10, %p764_p9 }
 0x116   : > { %p762_p8 = pneg %p761_p7 }
 0x118   : > { %p767_p12 = pnand %p766_p11, %p762_p8 }
 0x11a   : > { %770 = shalt.err (!%p767_p12)
}
 0x11b   : > { %706 = dma.vmem_to_hbm [thread:$0]  (%p866_p5), %s534_s26, 32, %s1019_s29, %s516_s30  }
 0x11c PF: > { %p712_p13 = scmp.ge.s32.totalorder %s805_s15, 2  ;;  %s553_s19 = sand.u32 1, %s793_s12  }
 0x11d   : > { %s554_s20 = scalar_lea.sflag [#allocation3], %s553_s19 }
 0x11e   : > { %p709_p0 = pnand %p712_p13, %p870_p6 }
 0x120   : > { %p710_p1 = pneg %p709_p0 }
 0x122   : > { %788 = dma.done.wait (%p710_p1), %s554_s20, 32  }
 0x123   : > { %790 = vsyncadd (%p710_p1), %s554_s20, 4294967264  ;;  %p14_p2 = scmp.ge.s32.totalorder %s853_s18, 6   ;;  %s1060_s12 = smov %s797_s13 }
 0x124   : > { %s1061_s13 = smov %s801_s14  ;;  %s1062_s14 = smov %s864_s21 }
 0x125   : > { %s1063_s15 = smov %s853_s18  ;;  %16 = sbr.rel (!%p14_p2) target bundleno = 3 (0x3), region = 75 }
 0x12a   :  { %559 = vsyncpa [#allocation3], 1 }
 0x12b   :  { %561 = vsyncpa [#allocation3 + $0x1], 1 }

</bundles_post_ra>
